<compile_context>
chip_gen: v7x
topology: tpu7x:2x2x1
jax: 0.10.0
libtpu: 0.0.40
codegen_flags: <defaults>
</compile_context>

<pallas_src>
import functools

import jax
import jax.numpy as jnp
import numpy as np
from jax import lax
from jax.experimental import pallas as pl
from jax.experimental.pallas import tpu as pltpu

_LANES = 128   # lane-dense width for the padded fc2 activation
_C_PAD = 8     # logits padded to 8 sublanes (transposed, lane-dense output)


def _text_classifier_kernel(n_tokens,                       # static (closed over)
                            ids_ref,                        # SMEM, scalar prefetch
                            table_ref,                      # VMEM (V, 64) folded emb@W1
                            b1_ref, w2_ref, b2_ref, w3t_ref, b3_ref,
                            out_ref,                        # (8, TN) transposed logits tile
                            gbuf):                          # VMEM scratch (TN, 64)
    tn = gbuf.shape[0]
    base = pl.program_id(0) * tn
    # Number of real (non-pad) token rows in this tile; pad rows are skipped.
    rows = jnp.clip(n_tokens - base, 0, tn)

    @pl.when(rows < tn)
    def _():
        # Keep pad rows deterministic (they are sliced off in the wrapper).
        gbuf[...] = jnp.zeros_like(gbuf)

    # In-VMEM row gather: dynamic first-axis indexing of the resident table.
    def gather_row(t, carry):
        rid = ids_ref[base + t]
        gbuf[pl.ds(t, 1), :] = table_ref[pl.ds(rid, 1), :]
        return carry
    lax.fori_loop(0, rows, gather_row, 0)

    # gbuf holds rows of (emb @ W1) for this tile's tokens.
    h1 = jnp.maximum(gbuf[...] + b1_ref[...], 0.0)                        # (TN, 64)
    h2 = jnp.dot(h1, w2_ref[...], preferred_element_type=jnp.float32)     # (TN, 128)
    h2 = jnp.maximum(h2 + b2_ref[...], 0.0)                               # padded cols stay 0
    # Transposed fc3: (C_pad, 128) contracted with h2's lane dim -> (C_pad, TN).
    out_t = lax.dot_general(w3t_ref[...], h2,
                            dimension_numbers=(((1,), (1,)), ((), ())),
                            preferred_element_type=jnp.float32)           # (8, TN)
    out_ref[...] = out_t + b3_ref[...]


def prepare_params(emb_table, w1, b1, w2, b2, w3, b3):
    """One-time preprocessing (hoisted out of the forward path): fold fc1 into
    the embedding table and zero-pad fc2/fc3 into lane/sublane-dense layouts."""
    hi = lax.Precision.HIGHEST
    V, _ = emb_table.shape
    H1 = w1.shape[1]            # 64
    H2 = w2.shape[1]            # 16
    C = w3.shape[1]
    assert C <= _C_PAD and H2 <= _LANES

    # Fold fc1 into the embedding table (no nonlinearity in between).
    table = jnp.dot(emb_table.astype(jnp.float32), w1.astype(jnp.float32),
                    precision=hi)                                          # (V, 64)
    b1r = b1.reshape(1, H1).astype(jnp.float32)
    w2p = jnp.zeros((H1, _LANES), jnp.float32).at[:, :H2].set(w2.astype(jnp.float32))
    b2p = jnp.zeros((1, _LANES), jnp.float32).at[:, :H2].set(
        b2.reshape(1, -1).astype(jnp.float32))
    # fc3 stored transposed: rows = padded classes, cols = padded hidden.
    w3tp = jnp.zeros((_C_PAD, _LANES), jnp.float32).at[:C, :H2].set(
        w3.T.astype(jnp.float32))
    b3c = jnp.zeros((_C_PAD, 1), jnp.float32).at[:C, 0].set(b3.astype(jnp.float32))
    return dict(table=table, b1=b1r, w2=w2p, b2=b2p, w3t=w3tp, b3=b3c,
                vocab_size=V, num_classes=C)


def text_classifier_forward(text, prepared, *, row_tile=256):
    """text: (B, S) int token ids.  Returns logits (B, S, num_classes) f32."""
    B, S = text.shape
    N = B * S
    table = prepared["table"]
    V, H1 = table.shape
    C = prepared["num_classes"]

    # Output lane axis must be a multiple of 128; don't blow up the pad
    # fraction for tiny batches.
    row_tile = max(128, min(row_tile, 128 * pl.cdiv(N, 128)))
    assert row_tile % 128 == 0
    n_tiles = pl.cdiv(N, row_tile)
    n_pad = n_tiles * row_tile

    # Clamp ids (PyTorch would raise on out-of-range); pad the token axis.
    ids = jnp.zeros((n_pad,), jnp.int32).at[:N].set(
        jnp.clip(text.reshape(-1).astype(jnp.int32), 0, V - 1))

    table_bytes = V * H1 * 4
    # TODO(synk): for very large vocabularies (folded table >~20 MiB) fall back
    # to an HBM-resident table with a deep manual DMA-gather window; this
    # VMEM-resident fast path assumes the table fits the per-core budget
    # (v7x has 64 MiB per TensorCore).
    vmem_limit = int(min(max(2 * table_bytes + (8 << 20), 32 << 20), 48 << 20))

    grid_spec = pltpu.PrefetchScalarGridSpec(
        num_scalar_prefetch=1,
        grid=(n_tiles,),
        in_specs=[
            pl.BlockSpec((V, H1), lambda i, ids: (0, 0)),           # folded table (VMEM resident)
            pl.BlockSpec((1, H1), lambda i, ids: (0, 0)),           # b1
            pl.BlockSpec((H1, _LANES), lambda i, ids: (0, 0)),      # w2 (padded)
            pl.BlockSpec((1, _LANES), lambda i, ids: (0, 0)),       # b2 (padded)
            pl.BlockSpec((_C_PAD, _LANES), lambda i, ids: (0, 0)),  # w3^T (padded)
            pl.BlockSpec((_C_PAD, 1), lambda i, ids: (0, 0)),       # b3 (column)
        ],
        out_specs=pl.BlockSpec((_C_PAD, row_tile), lambda i, ids: (0, i)),
        scratch_shapes=[
            pltpu.VMEM((row_tile, H1), jnp.float32),   # gathered (emb@W1) rows
        ],
    )

    out_t = pl.pallas_call(
        functools.partial(_text_classifier_kernel, N),
        out_shape=jax.ShapeDtypeStruct((_C_PAD, n_pad), jnp.float32),
        grid_spec=grid_spec,
        compiler_params=pltpu.CompilerParams(
            dimension_semantics=("parallel",),
            vmem_limit_bytes=vmem_limit),
    )(ids, table, prepared["b1"], prepared["w2"], prepared["b2"],
      prepared["w3t"], prepared["b3"])

    # (C_pad, n_pad) -> (B, S, C)
    return out_t[:C, :N].T.reshape(B, S, C)


def init_params(key, vocab_size, embedding_dim, num_classes):
    """Matches the module's init_weights: uniform(-0.5, 0.5) weights, zero
    biases.  Linear weights stored as (in_features, out_features)."""
    init_range = 0.5
    k_emb, k1, k2, k3 = jax.random.split(key, 4)
    emb = jax.random.uniform(k_emb, (vocab_size, embedding_dim),
                             minval=-init_range, maxval=init_range,
                             dtype=jnp.float32)
    w1 = jax.random.uniform(k1, (embedding_dim, 64), minval=-init_range,
                            maxval=init_range, dtype=jnp.float32)
    b1 = jnp.zeros((64,), jnp.float32)
    w2 = jax.random.uniform(k2, (64, 16), minval=-init_range,
                            maxval=init_range, dtype=jnp.float32)
    b2 = jnp.zeros((16,), jnp.float32)
    w3 = jax.random.uniform(k3, (16, num_classes), minval=-init_range,
                            maxval=init_range, dtype=jnp.float32)
    b3 = jnp.zeros((num_classes,), jnp.float32)
    return emb, w1, b1, w2, b2, w3, b3


def reference_forward(text, emb_table, w1, b1, w2, b2, w3, b3):
    hi = lax.Precision.HIGHEST
    e = emb_table[text]                                        # (B, S, D)
    x = jnp.maximum(jnp.dot(e, w1, precision=hi) + b1, 0.0)
    x = jnp.maximum(jnp.dot(x, w2, precision=hi) + b2, 0.0)
    return jnp.dot(x, w3, precision=hi) + b3


if __name__ == "__main__":
    vocab_size = 128
    embedding_dim = 32
    num_classes = 4
    batch, seq = 2, 8

    key = jax.random.PRNGKey(0)
    k_params, k_text = jax.random.split(key)
    params = init_params(k_params, vocab_size, embedding_dim, num_classes)
    text = jax.random.randint(k_text, (batch, seq), 0, vocab_size,
                              dtype=jnp.int32)

    # Fold + pad once, outside the forward path (per performance review).
    prepared = prepare_params(*params)
    fwd = jax.jit(functools.partial(text_classifier_forward, prepared=prepared))

    logits = jax.block_until_ready(fwd(text))

    ref = reference_forward(text, *params)
    assert logits.shape == (batch, seq, num_classes)
    np.testing.assert_allclose(np.asarray(logits), np.asarray(ref),
                               rtol=1e-4, atol=1e-4)
    print("KERNEL_OK")
</pallas_src>

<mosaic_0001>
module attributes {stable_mosaic.version = 11 : i64} {
  func.func @_text_classifier_kernel(%arg0: i32, %arg1: memref<128xi32, #tpu.memory_space<smem>>, %arg2: memref<128x64xf32, #tpu.memory_space<vmem>>, %arg3: memref<1x64xf32, #tpu.memory_space<vmem>>, %arg4: memref<64x128xf32, #tpu.memory_space<vmem>>, %arg5: memref<1x128xf32, #tpu.memory_space<vmem>>, %arg6: memref<8x128xf32, #tpu.memory_space<vmem>>, %arg7: memref<8x1xf32, #tpu.memory_space<vmem>>, %arg8: memref<8x128xf32, #tpu.memory_space<vmem>>, %arg9: memref<128x64xf32, #tpu.memory_space<vmem>>) attributes {dimension_semantics = [#tpu.dimension_semantics<parallel>], iteration_bounds = array<i64: 1>, scalar_prefetch = 1 : i64, scratch_operands = 1 : i64, tpu.core_type = #tpu.core_type<tc>, window_params = [{pipeline_mode = #tpu.pipeline_mode<synchronous>, transform_indices = @transform_0, window_bounds = array<i64: 128, 64>}, {pipeline_mode = #tpu.pipeline_mode<synchronous>, transform_indices = @transform_1, window_bounds = array<i64: 1, 64>}, {pipeline_mode = #tpu.pipeline_mode<synchronous>, transform_indices = @transform_2, window_bounds = array<i64: 64, 128>}, {pipeline_mode = #tpu.pipeline_mode<synchronous>, transform_indices = @transform_3, window_bounds = array<i64: 1, 128>}, {pipeline_mode = #tpu.pipeline_mode<synchronous>, transform_indices = @transform_4, window_bounds = array<i64: 8, 128>}, {pipeline_mode = #tpu.pipeline_mode<synchronous>, transform_indices = @transform_5, window_bounds = array<i64: 8, 1>}, {transform_indices = @transform_6, window_bounds = array<i64: 8, 128>}]} {
    %c128_i32 = arith.constant 128 : i32
    %0 = arith.muli %arg0, %c128_i32 : i32
    %c16_i32 = arith.constant 16 : i32
    %1 = arith.subi %c16_i32, %0 : i32
    %c0_i32 = arith.constant 0 : i32
    %c128_i32_0 = arith.constant 128 : i32
    %2 = arith.maxsi %c0_i32, %1 : i32
    %3 = arith.minsi %c128_i32_0, %2 : i32
    %c128_i32_1 = arith.constant 128 : i32
    %4 = arith.cmpi slt, %3, %c128_i32_1 : i32
    %5 = arith.extui %4 : i1 to i32
    %c0_i32_2 = arith.constant 0 : i32
    %6 = arith.cmpi ne, %5, %c0_i32_2 : i32
    scf.if %6 {
      %cst_21 = arith.constant 0.000000e+00 : f32
      %28 = vector.broadcast %cst_21 : f32 to vector<128x64xf32>
      %c0_22 = arith.constant 0 : index
      %c0_23 = arith.constant 0 : index
      %29 = vector.load %arg9[%c0_22, %c0_23] : memref<128x64xf32, #tpu.memory_space<vmem>>, vector<128x64xf32>
      tpu.vector_store %arg9[%c0_22, %c0_23], %28 {strides = array<i32>} : memref<128x64xf32, #tpu.memory_space<vmem>>, vector<128x64xf32>,
    } else {
    }
    %c0_i32_3 = arith.constant 0 : i32
    %c0_i32_4 = arith.constant 0 : i32
    %7 = arith.subi %3, %c0_i32_4 : i32
    %8 = arith.addi %c0_i32_4, %7 : i32
    %c1_i32 = arith.constant 1 : i32
    scf.for %arg10 = %c0_i32_4 to %8 step %c1_i32  : i32 {
      %28 = arith.addi %0, %arg10 : i32
      %29 = arith.index_cast %28 : i32 to index
      %30 = memref.load %arg1[%29] : memref<128xi32, #tpu.memory_space<smem>>
      %31 = arith.index_cast %30 : i32 to index
      %c0_21 = arith.constant 0 : index
      %32 = vector.load %arg2[%31, %c0_21] : memref<128x64xf32, #tpu.memory_space<vmem>>, vector<1x64xf32>
      %33 = arith.index_cast %arg10 : i32 to index
      %c0_22 = arith.constant 0 : index
      %34 = vector.load %arg9[%33, %c0_22] : memref<128x64xf32, #tpu.memory_space<vmem>>, vector<1x64xf32>
      tpu.vector_store %arg9[%33, %c0_22], %32 {strides = array<i32>} : memref<128x64xf32, #tpu.memory_space<vmem>>, vector<1x64xf32>,
    }
    %c0 = arith.constant 0 : index
    %c0_5 = arith.constant 0 : index
    %9 = vector.load %arg9[%c0, %c0_5] : memref<128x64xf32, #tpu.memory_space<vmem>>, vector<128x64xf32>
    %c0_6 = arith.constant 0 : index
    %c0_7 = arith.constant 0 : index
    %10 = vector.load %arg3[%c0_6, %c0_7] : memref<1x64xf32, #tpu.memory_space<vmem>>, vector<1x64xf32>
    %11 = vector.broadcast %10 : vector<1x64xf32> to vector<128x64xf32>
    %12 = arith.addf %9, %11 : vector<128x64xf32>
    %cst = arith.constant 0.000000e+00 : f32
    %13 = vector.broadcast %cst : f32 to vector<128x64xf32>
    %14 = arith.maximumf %12, %13 : vector<128x64xf32>
    %c0_8 = arith.constant 0 : index
    %c0_9 = arith.constant 0 : index
    %15 = vector.load %arg4[%c0_8, %c0_9] : memref<64x128xf32, #tpu.memory_space<vmem>>, vector<64x128xf32>
    %cst_10 = arith.constant dense<0.000000e+00> : vector<128x128xf32>
    %16 = tpu.matmul %14, %15, %cst_10 {dimension_numbers = #tpu.dot_dimension_numbers<[1], [0], [0], [1], [0, 0, 1, 1], [], []>} : vector<128x64xf32>, vector<64x128xf32>, vector<128x128xf32> -> vector<128x128xf32>
    %c0_11 = arith.constant 0 : index
    %c0_12 = arith.constant 0 : index
    %17 = vector.load %arg5[%c0_11, %c0_12] : memref<1x128xf32, #tpu.memory_space<vmem>>, vector<1x128xf32>
    %18 = vector.broadcast %17 : vector<1x128xf32> to vector<128x128xf32>
    %19 = arith.addf %16, %18 : vector<128x128xf32>
    %cst_13 = arith.constant 0.000000e+00 : f32
    %20 = vector.broadcast %cst_13 : f32 to vector<128x128xf32>
    %21 = arith.maximumf %19, %20 : vector<128x128xf32>
    %c0_14 = arith.constant 0 : index
    %c0_15 = arith.constant 0 : index
    %22 = vector.load %arg6[%c0_14, %c0_15] : memref<8x128xf32, #tpu.memory_space<vmem>>, vector<8x128xf32>
    %cst_16 = arith.constant dense<0.000000e+00> : vector<8x128xf32>
    %23 = tpu.matmul %22, %21, %cst_16 {dimension_numbers = #tpu.dot_dimension_numbers<[1], [1], [0], [0], [0, 0, 1, 0], [], []>} : vector<8x128xf32>, vector<128x128xf32>, vector<8x128xf32> -> vector<8x128xf32>
    %c0_17 = arith.constant 0 : index
    %c0_18 = arith.constant 0 : index
    %24 = vector.load %arg7[%c0_17, %c0_18] : memref<8x1xf32, #tpu.memory_space<vmem>>, vector<8x1xf32>
    %25 = vector.broadcast %24 : vector<8x1xf32> to vector<8x128xf32>
    %26 = arith.addf %23, %25 : vector<8x128xf32>
    %c0_19 = arith.constant 0 : index
    %c0_20 = arith.constant 0 : index
    %27 = vector.load %arg8[%c0_19, %c0_20] : memref<8x128xf32, #tpu.memory_space<vmem>>, vector<8x128xf32>
    tpu.vector_store %arg8[%c0_19, %c0_20], %26 {strides = array<i32>} : memref<8x128xf32, #tpu.memory_space<vmem>>, vector<8x128xf32>,
    return
  }
  func.func @transform_0(%arg0: i32, %arg1: memref<128xi32, #tpu.memory_space<smem>>) -> (i32, i32) {
    %c0_i32 = arith.constant 0 : i32
    %c0_i32_0 = arith.constant 0 : i32
    %c0_i32_1 = arith.constant 0 : i32
    return %c0_i32, %c0_i32_0 : i32, i32
  }
  func.func @transform_1(%arg0: i32, %arg1: memref<128xi32, #tpu.memory_space<smem>>) -> (i32, i32) {
    %c0_i32 = arith.constant 0 : i32
    %c0_i32_0 = arith.constant 0 : i32
    %c0_i32_1 = arith.constant 0 : i32
    return %c0_i32, %c0_i32_0 : i32, i32
  }
  func.func @transform_2(%arg0: i32, %arg1: memref<128xi32, #tpu.memory_space<smem>>) -> (i32, i32) {
    %c0_i32 = arith.constant 0 : i32
    %c0_i32_0 = arith.constant 0 : i32
    %c0_i32_1 = arith.constant 0 : i32
    return %c0_i32, %c0_i32_0 : i32, i32
  }
  func.func @transform_3(%arg0: i32, %arg1: memref<128xi32, #tpu.memory_space<smem>>) -> (i32, i32) {
    %c0_i32 = arith.constant 0 : i32
    %c0_i32_0 = arith.constant 0 : i32
    %c0_i32_1 = arith.constant 0 : i32
    return %c0_i32, %c0_i32_0 : i32, i32
  }
  func.func @transform_4(%arg0: i32, %arg1: memref<128xi32, #tpu.memory_space<smem>>) -> (i32, i32) {
    %c0_i32 = arith.constant 0 : i32
    %c0_i32_0 = arith.constant 0 : i32
    %c0_i32_1 = arith.constant 0 : i32
    return %c0_i32, %c0_i32_0 : i32, i32
  }
  func.func @transform_5(%arg0: i32, %arg1: memref<128xi32, #tpu.memory_space<smem>>) -> (i32, i32) {
    %c0_i32 = arith.constant 0 : i32
    %c0_i32_0 = arith.constant 0 : i32
    %c0_i32_1 = arith.constant 0 : i32
    return %c0_i32, %c0_i32_0 : i32, i32
  }
  func.func @transform_6(%arg0: i32, %arg1: memref<128xi32, #tpu.memory_space<smem>>) -> (i32, i32) {
    %c0_i32 = arith.constant 0 : i32
    %c0_i32_0 = arith.constant 0 : i32
    return %c0_i32, %arg0 : i32, i32
  }
}

</mosaic_0001>

<bundles_post_ra>
// kernel: text_classifier_forward.1
= control target key start
LH: loop header
LB: loop body
LE: loop exit
PB: predicated region body
PF: predicated region fallthrough
CT: control target
= control target key end

     0   :  { %s897_s0 = inlined_call_operand.vmem [shape: s32[128], index: 0, kind: input, shape index: {}]   ;;  %s898_s1 = inlined_call_operand.hbm [shape: f32[128,64], index: 1, kind: input, shape index: {}]   ;;  %s899_s2 = inlined_call_operand.vmem [shape: f32[1,64], index: 2, kind: input, shape index: {}]   ;;  %s900_s3 = inlined_call_operand.hbm [shape: f32[64,128], index: 3, kind: input, shape index: {}]   ;;  %s901_s4 = inlined_call_operand.vmem [shape: f32[1,128], index: 4, kind: input, shape index: {}]   ;;  %s902_s5 = inlined_call_operand.vmem [shape: f32[8,128], index: 5, kind: input, shape index: {}]   ;;  %s903_s6 = inlined_call_operand.vmem [shape: f32[8,1], index: 6, kind: input, shape index: {}]   ;;  %s904_s7 = inlined_call_operand.vmem [shape: f32[8,128], index: 7, kind: output, shape index: {}]  }
   0x1   :  { %s12_s26 = sshll.u32 %s897_s0, 4  ;;  %s13_s26 = int_to_ptr.vmem [resolvable:$true] %s12_s26 }
   0x2   :  { %s661_s27 = scalar_lea.vmem %s13_s26, 16  ;;  %p666_p1 = scmp.lt.s32.totalorder %s13_s26, %s13_s26 }
   0x3   :  { %p662_p0 = scmp.ne.s32.totalorder %s13_s26, %s661_s27  ;;  %p667_p2 = scmp.lt.s32.totalorder %s661_s27, %s661_s27 }
   0x5   :  { %p668_p3 = por %p667_p2, %p666_p1 }
   0x7   :  { %p669_p4 = pnand %p668_p3, %p662_p0 }
   0x9   :  { %672 = shalt.err (!%p669_p4)  }
   0xa   :  { %s731_s28 = smov [#allocation4]  }
   0xb   :  { %15 = dma.vmem_to_smem %s13_s26, 16, %s731_s28, [#allocation3] }
   0xc   :  { %721 = dma.done.wait [#allocation3], 16 }
   0xd   :  { %722 = vsyncadd [#allocation3], 4294967280 }
   0xe   :  { %17 = sfence }
   0xf   :  { %18 = vsyncpa [#allocation6], 0 }
  0x10   :  { %19 = vsyncpa [#allocation8], 0  ;;  %s732_s29 = smov [#allocation5]   ;;  %s673_s9 = scalar_lea.hbm %s898_s1, 2048 }
  0x11   :  { %s25_s30 = sshll.u32 %s732_s29, 4  ;;  %p674_p5 = scmp.ne.s32.totalorder %s898_s1, %s673_s9  ;;  %s26_s30 = int_to_ptr.vmem [resolvable:$true] %s25_s30 }
  0x12   :  { %p677_p6 = scmp.lt.u32.totalorder %s673_s9, %s898_s1 }
  0x14   :  { %p679_p7 = pnand %p677_p6, %p674_p5 }
  0x16   :  { %682 = shalt.err (!%p679_p7)
}
  0x17   :  { %s683_s14 = scalar_lea.vmem %s26_s30, 2048  ;;  %p688_p9 = scmp.lt.s32.totalorder %s26_s30, %s26_s30 }
  0x18   :  { %p684_p8 = scmp.ne.s32.totalorder %s26_s30, %s683_s14  ;;  %p689_p10 = scmp.lt.s32.totalorder %s683_s14, %s683_s14 }
  0x1a   :  { %p690_p11 = por %p689_p10, %p688_p9 }
  0x1c   :  { %p691_p12 = pnand %p690_p11, %p684_p8 }
  0x1e   :  { %694 = shalt.err (!%p691_p12)
}
  0x1f   :  { %s733_s15 = smov 128   ;;  %s734_s16 = smov 8  }
  0x20   :  { %31 = dma.hbm_to_vmem [thread:$0]  %s898_s1, 2048, %s26_s30, [#allocation6], %s733_s15, %s733_s15, %s734_s16  }
  0x21   :  { %s735_s19 = smov [#allocation7]   ;;  %s695_s23 = scalar_lea.hbm %s900_s3, 1024 }
  0x22   :  { %s39_s20 = sshll.u32 %s735_s19, 4  ;;  %p696_p13 = scmp.ne.s32.totalorder %s900_s3, %s695_s23  ;;  %s40_s20 = int_to_ptr.vmem [resolvable:$true] %s39_s20 }
  0x23   :  { %p699_p0 = scmp.lt.u32.totalorder %s695_s23, %s900_s3 }
  0x25   :  { %p701_p1 = pnand %p699_p0, %p696_p13 }
  0x27   :  { %704 = shalt.err (!%p701_p1)
}
  0x28   :  { %s705_s28 = scalar_lea.vmem %s40_s20, 1024  ;;  %p710_p3 = scmp.lt.s32.totalorder %s40_s20, %s40_s20 }
  0x29   :  { %p706_p2 = scmp.ne.s32.totalorder %s40_s20, %s705_s28  ;;  %p711_p4 = scmp.lt.s32.totalorder %s705_s28, %s705_s28 }
  0x2b   :  { %p712_p5 = por %p711_p4, %p710_p3 }
  0x2d   :  { %p713_p6 = pnand %p712_p5, %p706_p2 }
  0x2f   :  { %716 = shalt.err (!%p713_p6)
}
  0x30   :  { %45 = dma.hbm_to_vmem [thread:$0]  %s900_s3, 1024, %s40_s20, [#allocation8], %s733_s15, %s733_s15, %s734_s16  }
  0x31   :  { %723 = dma.done.wait [#allocation6], 2048  }
  0x32   :  { %724 = vsyncadd [#allocation6], 4294965248 }
  0x33   :  { %725 = dma.done.wait [#allocation8], 1024  }
  0x34   :  { %726 = vsyncadd [#allocation8], 4294966272  ;;  %vm68_vm0 = vcmask 523264   ;;  %v736_v0 = vmov 0.0   ;;  %s727_s3 = smov 0  }
  0x35   :  { %69 = vst.msk [vmem:[#allocation2] sm:$0xff] %vm68_vm0, %v736_v0  ;;  %70 = vst.msk [vmem:[#allocation2 + $0x8] sm:$0xff] %vm68_vm0, %v736_v0 }
  0x36   :  { %71 = vst.msk [vmem:[#allocation2 + $0x10] sm:$0xff] %vm68_vm0, %v736_v0  ;;  %72 = vst.msk [vmem:[#allocation2 + $0x18] sm:$0xff] %vm68_vm0, %v736_v0 }
  0x37   :  { %73 = vst.msk [vmem:[#allocation2 + $0x20] sm:$0xff] %vm68_vm0, %v736_v0  ;;  %74 = vst.msk [vmem:[#allocation2 + $0x28] sm:$0xff] %vm68_vm0, %v736_v0 }
  0x38   :  { %75 = vst.msk [vmem:[#allocation2 + $0x30] sm:$0xff] %vm68_vm0, %v736_v0  ;;  %76 = vst.msk [vmem:[#allocation2 + $0x38] sm:$0xff] %vm68_vm0, %v736_v0 }
  0x39   :  { %77 = vst.msk [vmem:[#allocation2 + $0x40] sm:$0xff] %vm68_vm0, %v736_v0  ;;  %78 = vst.msk [vmem:[#allocation2 + $0x48] sm:$0xff] %vm68_vm0, %v736_v0 }
  0x3a   :  { %79 = vst.msk [vmem:[#allocation2 + $0x50] sm:$0xff] %vm68_vm0, %v736_v0  ;;  %80 = vst.msk [vmem:[#allocation2 + $0x58] sm:$0xff] %vm68_vm0, %v736_v0 }
  0x3b   :  { %81 = vst.msk [vmem:[#allocation2 + $0x60] sm:$0xff] %vm68_vm0, %v736_v0  ;;  %82 = vst.msk [vmem:[#allocation2 + $0x68] sm:$0xff] %vm68_vm0, %v736_v0 }
  0x3c   :  { %83 = vst.msk [vmem:[#allocation2 + $0x70] sm:$0xff] %vm68_vm0, %v736_v0  ;;  %84 = vst.msk [vmem:[#allocation2 + $0x78] sm:$0xff] %vm68_vm0, %v736_v0 }
  0x3d LB: > { %s92_s30 = sld [smem:[#allocation4 + %s729_s3]]  ;;  %vm96_vm1 = vcmask 516096   ;;  %s95_s0 = scalar_lea.vmem [#allocation2], %s729_s3  ;;  %s729_s3 = sphi %s727_s3, %s88_s3  }
  0x3e   : > { %s88_s3 = sadd.s32 1, %s729_s3  }
  0x3f   : > { %p87_p7 = scmp.ge.s32.totalorder %s88_s3, 16 }
  0x40   :  { %v153_v2 = vld [vmem:[#allocation7] sm:$0xff] (%p87_p7)  ;;  %v154_v3 = vld [vmem:[#allocation7 + $0x8] sm:$0xff] (%p87_p7)  ;;  %v155_v4 = vld [vmem:[#allocation7 + $0x10] sm:$0xff] (%p87_p7)  ;;  %v737_v63 = vmov (%p87_p7), 0.0|0.0   ;;  %vm738_vm2 = vmmov (%p87_p7), 0  }
  0x41   :  { %90 = sbr.rel (!%p87_p7) target bundleno = 61 (0x3d), region = 65  ;;  %v603_v5 = vpack.c.bf16 (%p87_p7), %v154_v3, %v153_v2  ;;  %v156_v6 = vld [vmem:[#allocation7 + $0x18] sm:$0xff] (%p87_p7)  ;;  %v157_v8 = vld [vmem:[#allocation7 + $0x20] sm:$0xff] (%p87_p7)  ;;  %v158_v9 = vld [vmem:[#allocation7 + $0x28] sm:$0xff] (%p87_p7)  ;;  %619 = vmatprep.subr.bf16.mxu1 (%p87_p7), %v737_v63  ;;  %600 = vmatprep.mubr.msk.f32.mxu1 (%p87_p7), %vm738_vm2, %v736_v0  ;;  %v739_v2 = vmov (%p87_p7), 0  }
  0x42   :  { %v607_v7 = vpack.c.bf16 (%p87_p7), %v156_v6, %v155_v4  ;;  %v842_v11 = vld [vmem:[%s899_s2] ss:$0 sm:$0xff] (%p87_p7)  ;;  %v611_v13 = vpack.c.bf16 (%p87_p7), %v158_v9, %v157_v8  ;;  %v159_v14 = vld [vmem:[#allocation7 + $0x30] sm:$0xff] (%p87_p7)  ;;  %v160_v15 = vld [vmem:[#allocation7 + $0x38] sm:$0xff] (%p87_p7)  ;;  %660 = vset.pattern.permute.xlu0 (%p87_p7), %v739_v2 }
  0x43   : > { %s93_s8 = scalar_lea.vmem [#allocation5], %s92_s30  ;;  %604 = vmatprep.subr.bf16.mxu0 (%p87_p7), %v603_v5  ;;  %v615_v18 = vpack.c.bf16 (%p87_p7), %v160_v15, %v159_v14  ;;  %v470_v3 = vld [vmem:[%s901_s4] ss:$0 sm:$0xff] (%p87_p7) }
  0x44   : > { %v94_v1 = vld [vmem:[%s93_s8] sm:$0x1]  ;;  %606 = vmatpush3.bf16.msra.mxu0 (%p87_p7), %v603_v5 }
  0x45   : > { %97 = vst.msk [vmem:[%s95_s0] sm:$0x1] %vm96_vm1, %v94_v1  ;;  %608 = vmatprep.subr.bf16.mxu0 (%p87_p7), %v607_v7  ;;  %v379_v1 = vld [vmem:[%s903_s6] sm:$0xff] (%p87_p7) }
  0x46   :  { %382 = vperm.xlu0 (%p87_p7), %660, %v379_v1  }
  0x48   :  { %610 = vmatpush3.bf16.msra.mxu0 %v607_v7 }
  0x49   :  { %612 = vmatprep.subr.bf16.mxu0 %v611_v13 }
  0x4c   :  { %v98_v10 = vld [vmem:[#allocation2] sm:$0xff]  ;;  %v99_v17 = vld [vmem:[#allocation2 + $0x8] sm:$0xff]  ;;  %v100_v19 = vld [vmem:[#allocation2 + $0x10] sm:$0xff]  ;;  %614 = vmatpush3.bf16.msra.mxu0 %v611_v13 }
  0x4d   :  { %v121_v12 = vadd.f32 %v842_v11, %v98_v10  ;;  %v122_v20 = vadd.f32 %v842_v11, %v99_v17  ;;  %v123_v21 = vadd.f32 %v842_v11, %v100_v19  ;;  %v101_v22 = vld [vmem:[#allocation2 + $0x18] sm:$0xff]  ;;  %616 = vmatprep.subr.bf16.mxu0 %v615_v18  ;;  %v102_v23 = vld [vmem:[#allocation2 + $0x20] sm:$0xff]  ;;  %v103_v28 = vld [vmem:[#allocation2 + $0x28] sm:$0xff] }
  0x4e   :  { %v124_v25 = vadd.f32 %v842_v11, %v101_v22  ;;  %v125_v27 = vadd.f32 %v842_v11, %v102_v23  ;;  %v104_v29 = vld [vmem:[#allocation2 + $0x30] sm:$0xff]  ;;  %v126_v31 = vadd.f32 %v842_v11, %v103_v28  ;;  %v105_v34 = vld [vmem:[#allocation2 + $0x38] sm:$0xff]  ;;  %v106_v35 = vld [vmem:[#allocation2 + $0x40] sm:$0xff] }
  0x4f   :  { %v137_v16 = vmax.f32 %v121_v12, 0.0  ;;  %v138_v24 = vmax.f32 %v122_v20, 0.0  ;;  %v139_v26 = vmax.f32 %v123_v21, 0.0  ;;  %v127_v33 = vadd.f32 %v842_v11, %v104_v29  ;;  %v107_v40 = vld [vmem:[#allocation2 + $0x48] sm:$0xff]  ;;  %v108_v41 = vld [vmem:[#allocation2 + $0x50] sm:$0xff]  ;;  %v109_v46 = vld [vmem:[#allocation2 + $0x58] sm:$0xff] }
  0x50   :  { %618 = vmatpush3.bf16.msra.mxu0 %v615_v18  ;;  %v140_v30 = vmax.f32 %v124_v25, 0.0  ;;  %v141_v32 = vmax.f32 %v125_v27, 0.0  ;;  %v142_v36 = vmax.f32 %v126_v31, 0.0  ;;  %v128_v37 = vadd.f32 %v842_v11, %v105_v34  ;;  %v110_v47 = vld [vmem:[#allocation2 + $0x60] sm:$0xff]  ;;  %v111_v52 = vld [vmem:[#allocation2 + $0x68] sm:$0xff]  ;;  %v112_v53 = vld [vmem:[#allocation2 + $0x70] sm:$0xff] }
  0x51   :  { %544 = vmatprep.mubr.msk.f32.mxu0 %vm68_vm0, %v137_v16  ;;  %v143_v38 = vmax.f32 %v127_v33, 0.0  ;;  %v129_v39 = vadd.f32 %v842_v11, %v106_v35  ;;  %v130_v43 = vadd.f32 %v842_v11, %v107_v40  ;;  %v131_v45 = vadd.f32 %v842_v11, %v108_v41  ;;  %v113_v58 = vld [vmem:[#allocation2 + $0x78] sm:$0xff] }
  0x52   :  { %v144_v42 = vmax.f32 %v128_v37, 0.0  ;;  %v132_v49 = vadd.f32 %v842_v11, %v109_v46  ;;  %v133_v51 = vadd.f32 %v842_v11, %v110_v47  ;;  %v134_v55 = vadd.f32 %v842_v11, %v111_v52 }
  0x53   :  { %545 = vmatmul.mubr.msk.f32.vlgmr.msra.gmra.mrb[0].mxu0 %vm68_vm0, %v138_v24  ;;  %v145_v44 = vmax.f32 %v129_v39, 0.0  ;;  %v146_v48 = vmax.f32 %v130_v43, 0.0  ;;  %v147_v50 = vmax.f32 %v131_v45, 0.0  ;;  %v135_v57 = vadd.f32 %v842_v11, %v112_v53 }
  0x54   :  { %547 = vmatprep.mubr.msk.f32.mxu0 %vm68_vm0, %v139_v26  ;;  %v148_v54 = vmax.f32 %v132_v49, 0.0  ;;  %v149_v56 = vmax.f32 %v133_v51, 0.0  ;;  %v150_v59 = vmax.f32 %v134_v55, 0.0  ;;  %v136_v60 = vadd.f32 %v842_v11, %v113_v58 }
  0x55   :  { %v151_v61 = vmax.f32 %v135_v57, 0.0 }
  0x56   :  { %v152_v62 = vmax.f32 %v136_v60, 0.0 }
  0x57   :  { %548 = vmatmul.mubr.msk.f32.gmra.mrb[2].mxu0 %vm68_vm0, %v140_v30 }
  0x58   :  { %550 = vmatprep.mubr.msk.f32.mxu0 %vm68_vm0, %v141_v32 }
  0x5b   :  { %551 = vmatmul.mubr.msk.f32.gmra.mrb[4].mxu0 %vm68_vm0, %v142_v36 }
  0x5c   :  { %553 = vmatprep.mubr.msk.f32.mxu0 %vm68_vm0, %v143_v38 }
  0x5f   :  { %554 = vmatmul.mubr.msk.f32.gmra.mrb[6].mxu0 %vm68_vm0, %v144_v42 }
  0x60   :  { %556 = vmatprep.mubr.msk.f32.mxu0 %vm68_vm0, %v145_v44 }
  0x63   :  { %557 = vmatmul.mubr.msk.f32.gmra.mrb[8].mxu0 %vm68_vm0, %v146_v48 }
  0x64   :  { %559 = vmatprep.mubr.msk.f32.mxu0 %vm68_vm0, %v147_v50 }
  0x67   :  { %560 = vmatmul.mubr.msk.f32.gmra.mrb[10].mxu0 %vm68_vm0, %v148_v54 }
  0x68   :  { %562 = vmatprep.mubr.msk.f32.mxu0 %vm68_vm0, %v149_v56 }
  0x6b   :  { %563 = vmatmul.mubr.msk.f32.gmra.mrb[12].mxu0 %vm68_vm0, %v150_v59  ;;  %v378_v59 = vld [vmem:[%s902_s5] sm:$0xff] }
  0x6c   :  { %565 = vmatprep.mubr.msk.f32.mxu0 %vm68_vm0, %v151_v61 }
  0x6f   :  { %566 = vmatmul.mubr.msk.f32.gmra.mrb[14].mxu0 %vm68_vm0, %v152_v62 }
  0xc5   :  { %v383_v60 = vpop.permute.xlu0 %382 }
 0x126   :  { %v546_v4 = vpop.f32.mrb[0].mxu0 }
 0x127   :  { %v289_v5 = vadd.f32 %v546_v4, %v470_v3  ;;  %v283_v6 = vpop.f32.mrb[1].mxu0 }
 0x128   :  { %v284_v7 = vadd.f32 %v470_v3, %v283_v6 }
 0x129   :  { %v363_v8 = vmax.f32 %v289_v5, 0.0 }
 0x12a   :  { %v362_v9 = vmax.f32 %v284_v7, 0.0  ;;  %v549_v10 = vpop.f32.mrb[2].mxu0 }
 0x12b   :  { %v299_v11 = vadd.f32 %v549_v10, %v470_v3  ;;  %v293_v0 = vpop.f32.mrb[3].mxu0 }
 0x12c   :  { %v294_v12 = vadd.f32 %v470_v3, %v293_v0  ;;  %v620_v13 = vpack.c.bf16 %v363_v8, %v362_v9 }
 0x12d   :  { %v365_v14 = vmax.f32 %v299_v11, 0.0 }
 0x12e   :  { %v364_v15 = vmax.f32 %v294_v12, 0.0  ;;  %621 = vmatpush3.bf16.xpose.msra.mxu1 %v620_v13  ;;  %v552_v16 = vpop.f32.mrb[4].mxu0 }
 0x12f   :  { %v309_v17 = vadd.f32 %v552_v16, %v470_v3  ;;  %622 = vmatprep.subr.bf16.mxu1 %v737_v63  ;;  %v303_v18 = vpop.f32.mrb[5].mxu0 }
 0x130   :  { %v623_v19 = vpack.c.bf16 %v365_v14, %v364_v15  ;;  %v304_v20 = vadd.f32 %v470_v3, %v303_v18 }
 0x131   :  { %v367_v21 = vmax.f32 %v309_v17, 0.0 }
 0x132   :  { %v366_v22 = vmax.f32 %v304_v20, 0.0  ;;  %v555_v23 = vpop.f32.mrb[6].mxu0 }
 0x133   :  { %v319_v24 = vadd.f32 %v555_v23, %v470_v3  ;;  %v313_v25 = vpop.f32.mrb[7].mxu0 }
 0x134   :  { %v626_v26 = vpack.c.bf16 %v367_v21, %v366_v22  ;;  %v314_v27 = vadd.f32 %v470_v3, %v313_v25 }
 0x135   :  { %v369_v28 = vmax.f32 %v319_v24, 0.0 }
 0x136   :  { %624 = vmatpush3.bf16.xpose.msra.mxu1 %v623_v19  ;;  %v368_v29 = vmax.f32 %v314_v27, 0.0  ;;  %v558_v30 = vpop.f32.mrb[8].mxu0 }
 0x137   :  { %625 = vmatprep.subr.bf16.mxu1 %v737_v63  ;;  %v329_v31 = vadd.f32 %v558_v30, %v470_v3  ;;  %v323_v32 = vpop.f32.mrb[9].mxu0 }
 0x138   :  { %v629_v33 = vpack.c.bf16 %v369_v28, %v368_v29  ;;  %v324_v34 = vadd.f32 %v470_v3, %v323_v32 }
 0x139   :  { %v371_v35 = vmax.f32 %v329_v31, 0.0 }
 0x13a   :  { %v370_v36 = vmax.f32 %v324_v34, 0.0  ;;  %v561_v37 = vpop.f32.mrb[10].mxu0 }
 0x13b   :  { %v339_v38 = vadd.f32 %v561_v37, %v470_v3  ;;  %v333_v39 = vpop.f32.mrb[11].mxu0 }
 0x13c   :  { %v632_v40 = vpack.c.bf16 %v371_v35, %v370_v36  ;;  %v334_v41 = vadd.f32 %v470_v3, %v333_v39 }
 0x13d   :  { %v373_v42 = vmax.f32 %v339_v38, 0.0 }
 0x13e   :  { %627 = vmatpush3.bf16.xpose.msra.mxu1 %v626_v26  ;;  %v372_v43 = vmax.f32 %v334_v41, 0.0  ;;  %v564_v44 = vpop.f32.mrb[12].mxu0 }
 0x13f   :  { %628 = vmatprep.subr.bf16.mxu1 %v737_v63  ;;  %v349_v45 = vadd.f32 %v564_v44, %v470_v3  ;;  %v343_v46 = vpop.f32.mrb[13].mxu0 }
 0x140   :  { %v635_v47 = vpack.c.bf16 %v373_v42, %v372_v43  ;;  %v344_v48 = vadd.f32 %v470_v3, %v343_v46 }
 0x141   :  { %v375_v49 = vmax.f32 %v349_v45, 0.0 }
 0x142   :  { %v374_v50 = vmax.f32 %v344_v48, 0.0  ;;  %v567_v51 = vpop.f32.mrb[14].mxu0 }
 0x143   :  { %v359_v52 = vadd.f32 %v567_v51, %v470_v3  ;;  %v353_v53 = vpop.f32.mrb[15].mxu0 }
 0x144   :  { %v638_v54 = vpack.c.bf16 %v375_v49, %v374_v50  ;;  %v354_v55 = vadd.f32 %v470_v3, %v353_v53 }
 0x145   :  { %v377_v56 = vmax.f32 %v359_v52, 0.0 }
 0x146   :  { %630 = vmatpush3.bf16.xpose.msra.mxu1 %v629_v33  ;;  %v376_v57 = vmax.f32 %v354_v55, 0.0 }
 0x147   :  { %631 = vmatprep.subr.bf16.mxu1 %v737_v63 }
 0x148   :  { %v641_v58 = vpack.c.bf16 %v377_v56, %v376_v57 }
 0x14e   :  { %633 = vmatpush3.bf16.xpose.msra.mxu1 %v632_v40 }
 0x14f   :  { %634 = vmatprep.subr.bf16.mxu1 %v737_v63 }
 0x156   :  { %636 = vmatpush3.bf16.xpose.msra.mxu1 %v635_v47 }
 0x157   :  { %637 = vmatprep.subr.bf16.mxu1 %v737_v63 }
 0x15e   :  { %639 = vmatpush3.bf16.xpose.msra.mxu1 %v638_v54 }
 0x15f   :  { %640 = vmatprep.subr.bf16.mxu1 %v737_v63 }
 0x166   :  { %642 = vmatpush3.bf16.xpose.msra.mxu1 %v641_v58 }
 0x16d   :  { %601 = vmatmul.mubr.f32.vlgmr.msra.gmra.mrb[0].mxu1 %v378_v59 }
 0x240   :  { %v451_v61 = vpop.f32.mrb[0].mxu1 }
 0x241   :  { %v452_v62 = vadd.f32 %v451_v61, %v383_v60  ;;  %v602_v1 = vpop.f32.mrb[1].mxu1 }
 0x243   :  { %455 = vst [vmem:[%s904_s7] sm:$0xff] %v452_v62 }
 0x244   :  { %460 = vsyncpa [#allocation6], 1 }
 0x245   :  { %461 = vsyncpa [#allocation8], 1 }

</bundles_post_ra>
